<compile_context>
chip_gen: v5e
topology: v5e:2x2
jax: 0.10.0
libtpu: 0.0.40
codegen_flags: <defaults>
</compile_context>

<pallas_src>
import math

import jax
import jax.numpy as jnp
from jax.experimental import pallas as pl
from jax.experimental.pallas import tpu as pltpu


def sarf_kernel(f2_ref, f3_ref, x_ref, o_ref):
    # f2_ref / f3_ref: (1, L) per-feature constants (freq^2, freq^3), f32, resident.
    # x_ref / o_ref  : (TR, L) tile of the lane-dense flattened input/output.
    x = x_ref[...].astype(jnp.float32)
    # sgn^2 == 1, so x'^2 == (|x| + 1e-4)^2  -> drop the signbit/select path.
    ax = jnp.abs(x) + jnp.float32(1e-4)
    x2 = ax * ax
    # cos(f / (x2 + 1/f^2)) == cos(f^3 / (f^2 * x2 + 1)); reciprocal on the EUP.
    denom = f2_ref[...] * x2 + jnp.float32(1.0)
    arg = f3_ref[...] * pl.reciprocal(denom, approx=False)
    o_ref[...] = (jnp.cos(arg) * jnp.exp(-x2)).astype(o_ref.dtype)


def _default_tile_bytes() -> int:
    """Per-generation target bytes for one x (and one out) row tile."""
    try:
        kind = jax.devices()[0].device_kind.lower()
    except Exception:
        return 2 << 20
    if "v7" in kind:
        return 6 << 20   # 3.2 TB/s HBM: big tiles amortize ~0.35us/step overhead
    if "v6" in kind:
        return 4 << 20   # 1.4 TB/s
    return 2 << 20       # v5e & unknown: stay safely under the 16 MiB scoped default


def sarf_act(x: jax.Array, frequency: jax.Array,
             *, target_tile_bytes: int | None = None,
             donate_x: bool = False) -> jax.Array:
    """Apply the SARF activation. `frequency`: (F,), x: (..., F)."""
    orig_shape = x.shape
    F = frequency.shape[0]
    assert orig_shape[-1] == F, "feature axis must be last"

    if target_tile_bytes is None:
        target_tile_bytes = _default_tile_bytes()

    rows = 1
    for d in orig_shape[:-1]:
        rows *= d

    # ---- lane-dense regrouping: last axis must end up a multiple of 128 ----
    g = 1
    pad_f = 0
    F_eff = F
    if F % 128 != 0:
        need = 128 // math.gcd(F, 128)      # smallest g with (g*F) % 128 == 0
        if rows % need == 0:
            g = need
        else:
            # Awkward (F, rows): pad the feature axis to the next multiple of
            # 128 instead of falling back to masked partial stores.
            pad_f = (-F) % 128
            F_eff = F + pad_f
    # Widen the super-row while it divides evenly (helps very small F).
    while rows % (2 * g) == 0 and 2 * g * F_eff <= 8192:
        g *= 2
    L = g * F_eff
    super_rows = rows // g

    x2 = x.reshape(rows, F)
    if pad_f:
        x2 = jnp.pad(x2, ((0, 0), (0, pad_f)))
    x2d = x2.reshape(super_rows, L)

    # ---- per-feature constants, hoisted out of the kernel (kept in f32) ----
    f = frequency.astype(jnp.float32)
    if pad_f:
        f = jnp.pad(f, (0, pad_f), constant_values=1.0)   # dummy, sliced away
    f2 = f * f
    f3 = f2 * f
    f2_row = jnp.tile(f2.reshape(1, F_eff), (1, g))
    f3_row = jnp.tile(f3.reshape(1, F_eff), (1, g))

    # ---- row tile sized for ~target_tile_bytes per x/out tile --------------
    itemsize = jnp.dtype(x.dtype).itemsize
    sub = 8 * max(1, 4 // itemsize)         # 8 sublanes (f32), 16 (bf16), ...
    tr = target_tile_bytes // max(1, L * itemsize)
    tr = max(sub, (tr // sub) * sub)
    if tr >= super_rows:
        if super_rows >= 2 * sub:
            # Split into >= 2 blocks so both v7x TensorCores get work.
            half = (super_rows + 1) // 2
            tr = ((half + sub - 1) // sub) * sub
        else:
            tr = super_rows                 # single block: full-dim block OK
    grid = (pl.cdiv(super_rows, tr),)

    # ---- VMEM budget: x + out tiles, double-buffered, plus constants -------
    tile_bytes = tr * L * itemsize
    const_bytes = 2 * L * 4
    vmem_needed = 2 * 2 * tile_bytes + 2 * const_bytes
    vmem_limit = int(min(max(vmem_needed + (4 << 20), 16 << 20), 48 << 20))

    out2d = pl.pallas_call(
        sarf_kernel,
        out_shape=jax.ShapeDtypeStruct((super_rows, L), x.dtype),
        grid=grid,
        in_specs=[
            pl.BlockSpec((1, L), lambda i: (0, 0)),    # freq^2, resident
            pl.BlockSpec((1, L), lambda i: (0, 0)),    # freq^3, resident
            pl.BlockSpec((tr, L), lambda i: (i, 0)),   # x row tile
        ],
        out_specs=pl.BlockSpec((tr, L), lambda i: (i, 0)),
        compiler_params=pltpu.CompilerParams(
            dimension_semantics=("parallel",),
            vmem_limit_bytes=vmem_limit,
        ),
        # Optional: donate the flattened input buffer to the output to halve
        # peak HBM footprint when the caller no longer needs x.
        input_output_aliases=({2: 0} if donate_x else {}),
    )(f2_row, f3_row, x2d)

    out = out2d.reshape(rows, F_eff)
    if pad_f:
        out = out[:, :F]
    return out.reshape(orig_shape)


def sarf_ref(x, frequency):
    """Pure-JAX reference (mirrors the PyTorch forward exactly, in f32)."""
    x = x.astype(jnp.float32)
    f = frequency.astype(jnp.float32)
    sgn = jnp.where(jnp.signbit(x), 1.0, -1.0).astype(jnp.float32)
    xm = sgn * (jnp.abs(x) + 0.0001)
    x2 = xm * xm
    return jnp.cos(f / (x2 + 1.0 / f**2)) * jnp.exp(-x2)


if __name__ == "__main__":
    key = jax.random.PRNGKey(0)
    k_x, k_f, k_x2, k_f2, k_x3, k_f3, k_x4, k_f4 = jax.random.split(key, 8)
    fmin, fmax = 0.5, 1.5

    # --- demo shape matching the module: batch=2, seq=8, features_in=32 -----
    batch, seq, features_in = 2, 8, 32
    frequency = (jax.random.uniform(k_f, (features_in,), dtype=jnp.float32)
                 * (fmax - fmin) + fmin)
    x = jax.random.normal(k_x, (batch, seq, features_in), dtype=jnp.float32)

    y = jax.block_until_ready(sarf_act(x, frequency))
    y_ref = sarf_ref(x, frequency)
    assert y.shape == x.shape and y.dtype == x.dtype
    assert jnp.allclose(y, y_ref, atol=1e-5, rtol=1e-5), "mismatch vs reference"

    # --- F multiple of 128, multi-step grid + ragged last block -------------
    freq_b = (jax.random.uniform(k_f2, (128,), dtype=jnp.float32)
              * (fmax - fmin) + fmin)
    x_b = jax.random.normal(k_x2, (3, 7, 128), dtype=jnp.float32)
    y_b = jax.block_until_ready(sarf_act(x_b, freq_b, target_tile_bytes=4096))
    assert jnp.allclose(y_b, sarf_ref(x_b, freq_b), atol=1e-5, rtol=1e-5), \
        "mismatch (tiled path)"

    # --- awkward (F, rows): exercises the feature-padding lane-dense path ---
    freq_c = (jax.random.uniform(k_f3, (96,), dtype=jnp.float32)
              * (fmax - fmin) + fmin)
    x_c = jax.random.normal(k_x3, (2, 3, 96), dtype=jnp.float32)
    y_c = jax.block_until_ready(sarf_act(x_c, freq_c))
    assert jnp.allclose(y_c, sarf_ref(x_c, freq_c), atol=1e-5, rtol=1e-5), \
        "mismatch (padded-feature path)"

    # --- bf16 input: internal f32 math, cast only at the store --------------
    freq_d = (jax.random.uniform(k_f4, (256,), dtype=jnp.float32)
              * (fmax - fmin) + fmin)
    x_d = jax.random.normal(k_x4, (4, 16, 256), dtype=jnp.float32).astype(jnp.bfloat16)
    y_d = jax.block_until_ready(sarf_act(x_d, freq_d))
    assert y_d.dtype == jnp.bfloat16
    y_d_ref = sarf_ref(x_d, freq_d)
    assert jnp.allclose(y_d.astype(jnp.float32), y_d_ref, atol=2e-2, rtol=2e-2), \
        "mismatch (bf16 path)"

    print("KERNEL_OK")
</pallas_src>

<mosaic_0001>
module attributes {stable_mosaic.version = 11 : i64} {
  func.func @sarf_kernel(%arg0: i32, %arg1: memref<1x512xf32, #tpu.memory_space<vmem>>, %arg2: memref<1x512xf32, #tpu.memory_space<vmem>>, %arg3: memref<1x512xf32, #tpu.memory_space<vmem>>, %arg4: memref<1x512xf32, #tpu.memory_space<vmem>>) attributes {dimension_semantics = [#tpu.dimension_semantics<parallel>], iteration_bounds = array<i64: 1>, scalar_prefetch = 0 : i64, scratch_operands = 0 : i64, tpu.core_type = #tpu.core_type<tc>, window_params = [{pipeline_mode = #tpu.pipeline_mode<synchronous>, transform_indices = @transform_0, window_bounds = array<i64: 1, 512>}, {pipeline_mode = #tpu.pipeline_mode<synchronous>, transform_indices = @transform_1, window_bounds = array<i64: 1, 512>}, {transform_indices = @transform_2, window_bounds = array<i64: 1, 512>}, {transform_indices = @transform_3, window_bounds = array<i64: 1, 512>}]} {
    %c0 = arith.constant 0 : index
    %c0_0 = arith.constant 0 : index
    %0 = vector.load %arg3[%c0, %c0_0] : memref<1x512xf32, #tpu.memory_space<vmem>>, vector<1x512xf32>
    %1 = math.absf %0 : vector<1x512xf32>
    %cst = arith.constant 9.99999974E-5 : f32
    %2 = vector.broadcast %cst : f32 to vector<1x512xf32>
    %3 = arith.addf %1, %2 : vector<1x512xf32>
    %4 = arith.mulf %3, %3 : vector<1x512xf32>
    %c0_1 = arith.constant 0 : index
    %c0_2 = arith.constant 0 : index
    %5 = vector.load %arg1[%c0_1, %c0_2] : memref<1x512xf32, #tpu.memory_space<vmem>>, vector<1x512xf32>
    %6 = arith.mulf %5, %4 : vector<1x512xf32>
    %cst_3 = arith.constant 1.000000e+00 : f32
    %7 = vector.broadcast %cst_3 : f32 to vector<1x512xf32>
    %8 = arith.addf %6, %7 : vector<1x512xf32>
    %c0_4 = arith.constant 0 : index
    %c0_5 = arith.constant 0 : index
    %9 = vector.load %arg2[%c0_4, %c0_5] : memref<1x512xf32, #tpu.memory_space<vmem>>, vector<1x512xf32>
    %10 = tpu.reciprocal %8 : vector<1x512xf32> -> vector<1x512xf32>
    %11 = arith.mulf %9, %10 : vector<1x512xf32>
    %12 = math.cos %11 : vector<1x512xf32>
    %cst_6 = arith.constant 0.000000e+00 : f32
    %13 = vector.broadcast %cst_6 : f32 to vector<1x512xf32>
    %14 = arith.subf %13, %4 : vector<1x512xf32>
    %15 = math.exp %14 : vector<1x512xf32>
    %16 = arith.mulf %12, %15 : vector<1x512xf32>
    %c0_7 = arith.constant 0 : index
    %c0_8 = arith.constant 0 : index
    %17 = vector.load %arg4[%c0_7, %c0_8] : memref<1x512xf32, #tpu.memory_space<vmem>>, vector<1x512xf32>
    tpu.vector_store %arg4[%c0_7, %c0_8], %16 {strides = array<i32>} : memref<1x512xf32, #tpu.memory_space<vmem>>, vector<1x512xf32>,
    return
  }
  func.func @transform_0(%arg0: i32) -> (i32, i32) {
    %c0_i32 = arith.constant 0 : i32
    %c0_i32_0 = arith.constant 0 : i32
    %c0_i32_1 = arith.constant 0 : i32
    return %c0_i32, %c0_i32_0 : i32, i32
  }
  func.func @transform_1(%arg0: i32) -> (i32, i32) {
    %c0_i32 = arith.constant 0 : i32
    %c0_i32_0 = arith.constant 0 : i32
    %c0_i32_1 = arith.constant 0 : i32
    return %c0_i32, %c0_i32_0 : i32, i32
  }
  func.func @transform_2(%arg0: i32) -> (i32, i32) {
    %c0_i32 = arith.constant 0 : i32
    %c0_i32_0 = arith.constant 0 : i32
    return %arg0, %c0_i32 : i32, i32
  }
  func.func @transform_3(%arg0: i32) -> (i32, i32) {
    %c0_i32 = arith.constant 0 : i32
    %c0_i32_0 = arith.constant 0 : i32
    return %arg0, %c0_i32 : i32, i32
  }
}

</mosaic_0001>

<bundles_post_ra>
// kernel: tpu_custom_call.1
= control target key start
LH: loop header
LB: loop body
LE: loop exit
PB: predicated region body
PF: predicated region fallthrough
CT: control target
= control target key end

     0   :  { %8 = vsyncpa [#allocation3], 0  ;;  %s481_s0 = inlined_call_operand.hbm [shape: f32[1,512], index: 0, kind: input, shape index: {}]   ;;  %s482_s1 = inlined_call_operand.hbm [shape: f32[1,512], index: 1, kind: input, shape index: {}]   ;;  %s483_s2 = inlined_call_operand.hbm [shape: f32[1,512], index: 2, kind: input, shape index: {}]   ;;  %s484_s3 = inlined_call_operand.hbm [shape: f32[1,512], index: 3, kind: output, shape index: {}]  }
   0x1   :  { %9 = vsyncpa [#allocation6], 0  ;;  %s27_s14 = sshll.u32 %s482_s1, 4  ;;  %s28_s14 = int_to_ptr.hbm [resolvable:$true] %s27_s14 }
   0x2   :  { %10 = vsyncpa [#allocation4], 0  ;;  %s380_s15 = smov [#allocation5]   ;;  %s16_s19 = sshll.u32 %s481_s0, 4  ;;  %s17_s19 = int_to_ptr.hbm [resolvable:$true] %s16_s19 }
   0x3   :  { %s29_s16 = sshll.u32 %s380_s15, 4  ;;  %s381_s20 = smov [#allocation2]   ;;  %s30_s16 = int_to_ptr.vmem [resolvable:$true] %s29_s16 }
   0x4   :  { %32 = dma.hbm_to_vmem [thread:$0]  %s28_s14, 64, %s30_s16, [#allocation6]  }
   0x5   :  { %s18_s21 = sshll.u32 %s381_s20, 4  ;;  %s38_s24 = sshll.u32 %s483_s2, 4  ;;  %s19_s21 = int_to_ptr.vmem [resolvable:$true] %s18_s21  ;;  %s39_s24 = int_to_ptr.hbm [resolvable:$true] %s38_s24 }
   0x6   :  { %21 = dma.hbm_to_vmem [thread:$0]  %s17_s19, 64, %s19_s21, [#allocation3]  }
   0x7   :  { %s382_s1 = smov [#allocation7]  }
   0x8   :  { %s40_s25 = sshll.u32 %s382_s1, 4  ;;  %s41_s25 = int_to_ptr.vmem [resolvable:$true] %s40_s25 }
   0x9   :  { %43 = dma.hbm_to_vmem [thread:$0]  %s39_s24, 64, %s41_s25, [#allocation6]  }
   0xa   :  { %374 = dma.done.wait [#allocation3], 64  }
   0xb   :  { %375 = vsyncadd [#allocation3], 4294967232 }
   0xc   :  { %376 = dma.done.wait [#allocation6], 128  }
   0xd   :  { %377 = vsyncadd [#allocation6], 4294967168  ;;  %v56_v0 = vld [vmem:[#allocation7] sm:$0xf]  ;;  %v60_v3 = vld [vmem:[#allocation2] sm:$0xf] }
   0xe   :  { %v57_v1 = vand.u32 2147483647, %v56_v0  ;;  %v63_v15 = vld [vmem:[#allocation5] sm:$0xf]  ;;  %v383_v30 = vmov 683565275  }
   0xf   :  { %v384_v32 = vmov 2475754826   ;;  %v385_v34 = vmov 2131351028   ;;  %v386_v36 = vmov 2102212464  }
  0x10   :  { %v58_v2 = vadd.f32 0.0001, %v57_v1  ;;  %v387_v38 = vmov 920167782   ;;  %v388_v44 = vmov 1326507024  }
  0x11   :  { %s390_s0 = smov [#allocation8]   ;;  %s249_s28 = sshll.u32 %s484_s3, 4  ;;  %s250_s28 = int_to_ptr.hbm [resolvable:$true] %s249_s28 }
  0x12   :  { %v420_v4 = vmul.f32 %v58_v2, %v58_v2  ;;  %s247_s2 = sshll.u32 %s390_s0, 4  ;;  %s248_s2 = int_to_ptr.vmem [resolvable:$true] %s247_s2 }
  0x14   :  { %v61_v5 = vmul.f32 %v60_v3, %v420_v4 }
  0x16   :  { %v62_v6 = vadd.f32 1.0, %v61_v5 }
  0x18   :  { %274 = vrcp.f32 %v62_v6  ;;  %v75_v9 = vand.u32 2147483648, %v62_v6  ;;  %vm69_vm0 = vweird.f32 %v62_v6  ;;  %v73_v11 = vand.u32 2147483647, %v62_v6 }
  0x1a   :  { %v76_v13 = vor.u32 1.1754944e-38, %v75_v9  ;;  %vm74_vm3 = vcmp.eq.f32.partialorder %v73_v11, 8.507059e+37 }
  0x1e   :  { %v275_v7 = vpop.eup %274 }
  0x1f   :  { %v65_v8 = vmul.f32 %v275_v7, %v62_v6  ;;  %vm70_vm1 = vweird.f32 %v275_v7 }
  0x20   :  { %vm71_vm2 = vmor %vm69_vm0, %vm70_vm1 }
  0x21   :  { %v66_v10 = vsub.f32 1.0, %v65_v8 }
  0x23   :  { %v67_v12 = vmul.f32 %v275_v7, %v66_v10 }
  0x25   :  { %v68_v14 = vadd.f32 %v275_v7, %v67_v12 }
  0x27   :  { %v72_v16 = vsel %vm71_vm2, %v275_v7, %v68_v14 }
  0x28   :  { %v77_v17 = vsel %vm74_vm3, %v76_v13, %v72_v16 }
  0x29   :  { %v423_v18 = vmul.f32 %v77_v17, %v63_v15 }
  0x2b   :  { %v82_v19 = vand.u32 2139095040, %v423_v18  ;;  %v79_v21 = vand.u32 2147483647, %v423_v18  ;;  %vm81_vm0 = vcmp.lt.s32.totalorder %v423_v18, 0 }
  0x2d   :  { %v83_v20 = vshrl.u32 %v82_v19, 23  ;;  %v86_v24 = vand.u32 8388607, %v79_v21  ;;  %vm467_vm1 = vcmp.le.f32.partialorder %v79_v21, 0.7853982 }
  0x2f   :  { %v260_v22 = vadd.s32 4294967169, %v83_v20  ;;  %v87_v27 = vor.u32 8388608, %v86_v24  ;;  %v389_v20 = vmov 0  }
  0x31   :  { %v89_v23 = vadd.s32 1, %v260_v22  ;;  %v432_v46 = vshll.u32 %v87_v27, 8 }
  0x33   :  { %vm90_vm4 = vcmp.gt.s32.totalorder %v89_v23, 0  ;;  %v128_v58 = vand.u32 65535, %v432_v46  ;;  %v129_v59 = vshrl.u32 %v432_v46, 16 }
  0x34   :  { %v91_v25 = vsel %vm90_vm4, %v89_v23, 0 }
  0x35   :  { %v93_v26 = vand.u32 31, %v91_v25  ;;  %v429_v28 = vshrl.u32 %v91_v25, 5 }
  0x37   :  { %v94_v29 = vsub.s32 32, %v93_v26  ;;  %v96_v31 = vshll.u32 %v383_v30, %v93_v26  ;;  %v99_v33 = vshll.u32 %v384_v32, %v93_v26  ;;  %v102_v35 = vshll.u32 %v385_v34, %v93_v26 }
  0x38   :  { %v105_v37 = vshll.u32 %v386_v36, %v93_v26  ;;  %v108_v39 = vshll.u32 %v387_v38, %v93_v26  ;;  %vm111_vm5 = vcmp.lt.s32.totalorder %v429_v28, 1  ;;  %vm114_vm6 = vcmp.lt.s32.totalorder %v429_v28, 4 }
  0x39   :  { %v97_v40 = vshrl.u32 %v384_v32, %v94_v29  ;;  %v100_v41 = vshrl.u32 %v385_v34, %v94_v29  ;;  %v103_v42 = vshrl.u32 %v386_v36, %v94_v29  ;;  %v106_v43 = vshrl.u32 %v387_v38, %v94_v29 }
  0x3a   :  { %v109_v45 = vshrl.u32 %v388_v44, %v94_v29  ;;  %vm113_vm7 = vcmp.lt.s32.totalorder %v429_v28, 3  ;;  %vm112_vm8 = vcmp.lt.s32.totalorder %v429_v28, 2  ;;  %v95_v2 = vshrl.u32 %v383_v30, %v94_v29 }
  0x3b   :  { %v98_v47 = vor.u32 %v97_v40, %v96_v31  ;;  %v101_v48 = vor.u32 %v100_v41, %v99_v33  ;;  %v104_v49 = vor.u32 %v103_v42, %v102_v35  ;;  %v107_v50 = vor.u32 %v106_v43, %v105_v37 }
  0x3c   :  { %v110_v51 = vor.u32 %v109_v45, %v108_v39 }
  0x3d   :  { %v119_v52 = vsel %vm111_vm5, %v98_v47, %v101_v48  ;;  %v123_v53 = vsel %vm111_vm5, %v101_v48, %v104_v49  ;;  %v120_v54 = vsel %vm114_vm6, %v107_v50, 920167782  ;;  %v115_v16 = vsel %vm111_vm5, %v95_v2, %v98_v47 }
  0x3e   :  { %v124_v55 = vsel %vm114_vm6, %v110_v51, 1326507024  ;;  %v121_v56 = vsel %vm113_vm7, %v104_v49, %v120_v54  ;;  %v116_v19 = vsel %vm114_vm6, %v104_v49, 2102212464  ;;  %vm222_vm5 = vweird.f32 %v423_v18 }
  0x3f   :  { %v125_v57 = vsel %vm113_vm7, %v107_v50, %v124_v55  ;;  %v122_v60 = vsel %vm112_vm8, %v119_v52, %v121_v56  ;;  %v117_v31 = vsel %vm113_vm7, %v101_v48, %v116_v19 }
  0x40   :  { %v126_v61 = vsel %vm112_vm8, %v123_v53, %v125_v57  ;;  %v152_v0 = vand.u32 65535, %v122_v60  ;;  %v153_v1 = vshrl.u32 %v122_v60, 16  ;;  %v118_v39 = vsel %vm112_vm8, %v115_v16, %v117_v31 }
  0x41   :  { %v130_v62 = vand.u32 65535, %v126_v61  ;;  %v131_v63 = vshrl.u32 %v126_v61, 16  ;;  %v172_v43 = vmul.u32 %v432_v46, %v118_v39 }
  0x42   :  { %v154_v7 = vmul.u32 %v152_v0, %v128_v58  ;;  %v155_v8 = vmul.u32 %v153_v1, %v128_v58  ;;  %v156_v9 = vmul.u32 %v152_v0, %v129_v59  ;;  %v157_v13 = vmul.u32 %v153_v1, %v129_v59 }
  0x43   :  { %v132_v3 = vmul.u32 %v130_v62, %v128_v58  ;;  %v133_v5 = vmul.u32 %v131_v63, %v128_v58  ;;  %v134_v6 = vmul.u32 %v130_v62, %v129_v59  ;;  %v135_v10 = vmul.u32 %v131_v63, %v129_v59 }
  0x44   :  { %v158_v14 = vshll.u32 %v155_v8, 16  ;;  %v160_v15 = vshll.u32 %v156_v9, 16  ;;  %v159_v29 = vshrl.u32 %v155_v8, 16  ;;  %v161_v35 = vshrl.u32 %v156_v9, 16 }
  0x45   :  { %v136_v11 = vshll.u32 %v133_v5, 16  ;;  %v138_v12 = vshll.u32 %v134_v6, 16  ;;  %v137_v24 = vshrl.u32 %v133_v5, 16  ;;  %v139_v32 = vshrl.u32 %v134_v6, 16 }
  0x46   :  { %vm162_vm10 = vc.u32 %v154_v7, %v158_v14  ;;  %v164_v23 = vadd.s32 %v158_v14, %v154_v7 }
  0x47   :  { %vm140_vm9 = vc.u32 %v132_v3, %v136_v11  ;;  %v142_v17 = vadd.s32 %v136_v11, %v132_v3  ;;  %v163_v26 = vsel %vm162_vm10, 1, %v389_v20 }
  0x48   :  { %v141_v22 = vsel %vm140_vm9, 1, %v389_v20  ;;  %v165_v30 = vadd.s32 %v163_v26, %v157_v13  ;;  %vm166_vm12 = vc.u32 %v164_v23, %v160_v15  ;;  %v168_v38 = vadd.s32 %v164_v23, %v160_v15 }
  0x49   :  { %v143_v25 = vadd.s32 %v141_v22, %v135_v10  ;;  %vm144_vm11 = vc.u32 %v142_v17, %v138_v12  ;;  %v167_v34 = vsel %vm166_vm12, 1, %v389_v20  ;;  %v233_v15 = vsub.f32 0.0, %v420_v4 }
  0x4a   :  { %v145_v27 = vsel %vm144_vm11, 1, %v389_v20  ;;  %v169_v36 = vadd.s32 %v167_v34, %v165_v30 }
  0x4b   :  { %v147_v33 = vadd.s32 %v145_v27, %v143_v25  ;;  %v234_v22 = vmul.f32 1.442695, %v233_v15 }
  0x4c   :  { %v170_v40 = vadd.s32 %v169_v36, %v159_v29 }
  0x4d   :  { %v148_v37 = vadd.s32 %v147_v33, %v137_v24  ;;  %276 = vpow2.f32 %v234_v22 }
  0x4e   :  { %v171_v42 = vadd.s32 %v170_v40, %v161_v35 }
  0x4f   :  { %v149_v41 = vadd.s32 %v148_v37, %v139_v32  ;;  %v237_v32 = vlaneseq }
  0x50   :  { %v175_v44 = vadd.s32 1, %v171_v42 }
  0x51   :  { %vm174_vm13 = vc.u32 %v149_v41, %v168_v38  ;;  %v173_v28 = vadd.s32 %v168_v38, %v149_v41  ;;  %vm239_vm6 = vcmp.lt.s32.totalorder %v237_v32, 512 }
  0x52   :  { %v176_v45 = vsel %vm174_vm13, %v175_v44, %v171_v42 }
  0x53   :  { %v177_v47 = vadd.s32 %v176_v45, %v172_v43  ;;  %v277_v33 = vpop.eup %276 }
  0x55   :  { %v178_v48 = vadd.s32 536870912, %v177_v47 }
  0x57   :  { %v179_v49 = vshrl.u32 %v178_v48, 30 }
  0x59   :  { %v180_v50 = vshll.u32 %v179_v49, 30  ;;  %v203_v7 = vsub.s32 4, %v179_v49 }
  0x5b   :  { %v181_v51 = vsub.s32 %v177_v47, %v180_v50  ;;  %v204_v12 = vsel %vm81_vm0, %v203_v7, %v179_v49 }
  0x5c   :  { %v206_v21 = vsel %vm467_vm1, 0, %v204_v12 }
  0x5d   :  { %vm182_vm14 = vcmp.lt.s32.totalorder %v181_v51, 0  ;;  %v183_v52 = vsub.s32 0, %v181_v51  ;;  %v223_v23 = vand.u32 3, %v206_v21 }
  0x5f   :  { %v184_v53 = vsel %vm182_vm14, %v183_v52, %v181_v51  ;;  %vm228_vm2 = vcmp.eq.s32.totalorder %v223_v23, 2  ;;  %vm225_vm3 = vcmp.eq.s32.totalorder %v223_v23, 0  ;;  %vm224_vm4 = vcmp.lt.s32.totalorder %v223_v23, 2 }
  0x60   :  { %v185_v54 = vclz %v184_v53 }
  0x62   :  { %v261_v55 = vadd.s32 4294967294, %v185_v54 }
  0x64   :  { %vm262_vm15 = vcmp.lt.s32.totalorder %v261_v55, 0 }
  0x65   :  { %v188_v56 = vsel %vm262_vm15, 0, %v261_v55 }
  0x66   :  { %v189_v57 = vsub.s32 32, %v188_v56  ;;  %v190_v58 = vshll.u32 %v181_v51, %v188_v56  ;;  %v193_v59 = vsub.s32 4294967266, %v188_v56 }
  0x68   :  { %v191_v46 = vshrl.u32 %v173_v28, %v189_v57  ;;  %v194_v60 = vadd.s32 127, %v193_v59 }
  0x6a   :  { %v192_v61 = vor.u32 %v191_v46, %v190_v58  ;;  %v195_v62 = vshll.u32 %v194_v60, 23 }
  0x6c   :  { %v196_v63 = vor.u32 4788187, %v195_v62  ;;  %v199_v0 = vcvt.s32.f32 %v192_v61 }
  0x6e   :  { %v197_v1 = vand.u32 2147483647, %v196_v63 }
  0x70   :  { %v200_v2 = vmul.f32 %v199_v0, %v197_v1 }
  0x72   :  { %v201_v5 = vxor.u32 2147483648, %v200_v2 }
  0x74   :  { %v202_v6 = vsel %vm81_vm0, %v201_v5, %v200_v2 }
  0x75   :  { %v205_v8 = vsel %vm467_vm1, %v423_v18, %v202_v6 }
  0x76   :  { %v207_v9 = vmul.f32 %v205_v8, %v205_v8 }
  0x78   :  { %v208_v10 = vmul.f32 -0.001358992, %v207_v9  ;;  %v215_v11 = vmul.f32 -0.00019511016, %v207_v9 }
  0x7a   :  { %v209_v13 = vadd.f32 0.041655596, %v208_v10  ;;  %v216_v14 = vadd.f32 0.008332121, %v215_v11 }
  0x7c   :  { %v210_v16 = vmul.f32 %v209_v13, %v207_v9  ;;  %v217_v17 = vmul.f32 %v216_v14, %v207_v9 }
  0x7e   :  { %v211_v19 = vadd.f32 -0.4999988, %v210_v16  ;;  %v218_v20 = vadd.f32 -0.16666654, %v217_v17 }
  0x80   :  { %v212_v24 = vmul.f32 %v211_v19, %v207_v9  ;;  %v219_v25 = vmul.f32 %v218_v20, %v207_v9 }
  0x82   :  { %v213_v26 = vadd.f32 1.0, %v212_v24  ;;  %v220_v27 = vadd.f32 1.0, %v219_v25 }
  0x84   :  { %v221_v29 = vmul.f32 %v220_v27, %v205_v8  ;;  %v229_v30 = vxor.u32 2147483648, %v213_v26 }
  0x86   :  { %v226_v4 = vxor.u32 2147483648, %v221_v29  ;;  %v230_v31 = vsel %vm228_vm2, %v229_v30, %v221_v29 }
  0x88   :  { %v227_v34 = vsel %vm225_vm3, %v213_v26, %v226_v4 }
  0x89   :  { %v231_v35 = vsel %vm224_vm4, %v227_v34, %v230_v31 }
  0x8a   :  { %v232_v36 = vsel %vm222_vm5, nan, %v231_v35 }
  0x8b   :  { %v236_v37 = vmul.f32 %v277_v33, %v232_v36 }
  0x8d   :  { %241 = vst.msk [vmem:[#allocation8] sm:$0xf] %vm239_vm6, %v236_v37 }
  0x8e   :  { %252 = dma.vmem_to_hbm [thread:$0]  %s248_s2, 64, %s250_s28, [#allocation4]  }
  0x8f   :  { %378 = dma.done.wait [#allocation4], 64  }
  0x90   :  { %379 = vsyncadd [#allocation4], 4294967232 }
  0x91   :  { %257 = vsyncpa [#allocation3], 1 }
  0x92   :  { %258 = vsyncpa [#allocation6], 1 }
  0x93   :  { %259 = vsyncpa [#allocation4], 1 }

</bundles_post_ra>
